<compile_context>
chip_gen: v7x
topology: tpu7x:2x2x1
jax: 0.10.0
libtpu: 0.0.40
codegen_flags: <defaults>
</compile_context>

<pallas_src>
import math
import numpy as np
import jax
import jax.numpy as jnp
from jax.experimental import pallas as pl
from jax.experimental.pallas import tpu as pltpu

# ----------------- small, module-consistent configuration -----------------
B   = 2          # batch
L   = 16         # configs.seq_len
E   = 4          # configs.enc_in == configs.d_model (proj branch inactive: enc_in <= 1000)
NH  = 32         # HiPPO order N (module hardcodes window_size=[256]; scaled down here)
K   = 4          # configs.modes1 -> modes2 = min(modes1, seq_len // 2)
OUT = 3          # configs.out_dim
MULTISCALE = (1, 2, 4)
NS  = len(MULTISCALE)


# ----------------------- HiPPO-LegT parameter construction (float64, host) -----------------------
def lmu_transition(n):
    q = np.arange(n, dtype=np.float64)
    r = (2.0 * q + 1.0)[:, None]
    j, i = np.meshgrid(q, q)
    a = np.where(i < j, -1.0, (-1.0) ** (i - j + 1.0)) * r
    b = ((-1.0) ** q[:, None]) * r
    return a, b


def bilinear_discretize(a, b, dt):
    n = a.shape[0]
    eye = np.eye(n)
    m0 = eye - (dt / 2.0) * a
    ad = np.linalg.solve(m0, eye + (dt / 2.0) * a)
    bd = np.linalg.solve(m0, dt * b)
    return ad, bd


def legendre_eval_matrix(n, vals):
    # scipy.special.eval_legendre(np.arange(N)[:,None], 1 - 2*vals).T via recurrence
    x = 1.0 - 2.0 * vals
    t = x.shape[0]
    p = np.zeros((n, t), dtype=np.float64)
    p[0] = 1.0
    if n > 1:
        p[1] = x
    for m in range(2, n):
        p[m] = ((2 * m - 1) * x * p[m - 1] - (m - 1) * p[m - 2]) / m
    return p.T                      # (T, N)


# ------------- host-side algebraic fusion: per-scale linear chain -> (L, L) matrix -------------
def build_scale_transfer(A, Bv, evm, W):
    """T_s such that x_dec_row = x_row @ T_s for the linear chain
    HiPPO-LegT recurrence -> rfft -> per-mode complex mix -> irfft @ (L-1) -> Legendre proj.
    Built in float64 by pushing the L x L identity (unit time impulses) through the chain."""
    eye = np.eye(L, dtype=np.float64)                       # rows = unit impulses in time
    c = np.zeros((L, NH), dtype=np.float64)
    cs = []
    for t in range(L):                                      # c_t = c_{t-1} @ A^T + f_t * B
        c = c @ A.T + eye[:, t:t + 1] * Bv[None, :]
        cs.append(c)
    x_in_c = np.stack(cs, axis=-1)                          # (L, NH, L)
    x_ft = np.fft.rfft(x_in_c, axis=-1)
    out_ft = np.zeros((L, NH, L // 2 + 1), dtype=np.complex128)
    out_ft[:, :, :K] = np.einsum('rix,iox->rox', x_ft[:, :, :K], W)
    out1 = np.fft.irfft(out_ft, n=L, axis=-1)               # (L, NH, L)
    return out1[:, :, L - 1] @ evm[-L:, :].T                # (L, L)


# ----------------------------------- Pallas kernel -----------------------------------
# packed parameter slab layout: shape (8, L) float32, single VMEM tile, single DMA
_R_TVEC = 0            # row 0, cols 0:L          : fused transfer vector t_vec
_R_AFF  = 1            # rows 1:1+E, col 0 / col 1: affine_weight / affine_bias
_C_AFFW = 0
_C_AFFB = 1
_C_FCW  = 2            # rows 1:1+E, cols 2:2+OUT : fc weight transposed, (E, OUT)
_R_FCB  = 1 + E        # row 1+E,   cols 2:2+OUT  : fc bias
_R_MLPB = 2 + E        # row 2+E,   col 0         : mlp bias (scalar)


def film_kernel(x_ref, prm_ref, out_ref):
    x = x_ref[...]                                          # (B, E, L) f32

    # --- RevIN-style normalization over time (configs.ours == True) ---
    mean = jnp.mean(x, axis=-1, keepdims=True)              # (B, E, 1)
    xc = x - mean
    var = jnp.mean(xc * xc, axis=-1, keepdims=True)         # unbiased=False
    std = jnp.sqrt(var + 1e-5)
    affw = prm_ref[_R_AFF:_R_AFF + E, _C_AFFW:_C_AFFW + 1]  # (E, 1)
    affb = prm_ref[_R_AFF:_R_AFF + E, _C_AFFB:_C_AFFB + 1]  # (E, 1)
    xn = (xc / std) * affw + affb                           # (B, E, L)

    # --- HiPPO -> rfft -> spectral mix -> irfft@(L-1) -> Legendre recon ->
    #     multiscale mlp -> temporal mean, all folded host-side into t_vec (1, L).
    #     Pure VPU multiply + one lane reduction; no MXU pass, no (M,L) intermediate.
    tvec = prm_ref[_R_TVEC:_R_TVEC + 1, :]                  # (1, L), lane-aligned bcast
    mlpb = prm_ref[_R_MLPB:_R_MLPB + 1, 0:1]                # (1, 1)
    feat = jnp.sum(xn * tvec, axis=-1, keepdims=True) + mlpb   # (B, E, 1)

    # --- de-normalize (per-row constants commute with the temporal mean) ---
    feat = (feat - affb) / (affw + 1e-10) * std + mean      # (B, E, 1)

    # --- fc head: statically unrolled f32 multiply-accumulate (E == 4) ---
    acc = prm_ref[_R_FCB:_R_FCB + 1, _C_FCW:_C_FCW + OUT]   # fc bias (1, OUT)
    for e in range(E):
        acc = acc + feat[:, e, :] * prm_ref[_R_AFF + e:_R_AFF + e + 1,
                                            _C_FCW:_C_FCW + OUT]
    out_ref[...] = acc                                      # (B, OUT)


def film_forward_pallas(x_bel, prm):
    # No grid: whole-array VMEM blocks, no pipeline scaffolding at this size.
    return pl.pallas_call(
        film_kernel,
        out_shape=jax.ShapeDtypeStruct((B, OUT), jnp.float32),
        in_specs=[pl.BlockSpec(memory_space=pltpu.MemorySpace.VMEM),
                  pl.BlockSpec(memory_space=pltpu.MemorySpace.VMEM)],
        out_specs=pl.BlockSpec(memory_space=pltpu.MemorySpace.VMEM),
    )(x_bel, prm)


# ------------------- float64 numpy reference mirroring the PyTorch forward -------------------
def film_forward_reference_np(x_enc, A_list, Bv_list, eval_list, W_list,
                              aff_w, aff_b, mlp_w, mlp_b, fc_w, fc_b):
    x = np.asarray(x_enc, np.float64)                        # (B, L, E)
    means = x.mean(axis=1, keepdims=True)
    xc = x - means
    stdev = np.sqrt(xc.var(axis=1, keepdims=True) + 1e-5)    # unbiased=False
    xn = xc / stdev
    xn = xn * aff_w[None, None, :] + aff_b[None, None, :]

    x_decs = []
    for s in range(NS):
        A, Bv, evm, W = A_list[s], Bv_list[s], eval_list[s], W_list[s]
        inputs = xn.transpose(0, 2, 1)                        # (B, E, L)
        c = np.zeros((B, E, NH))
        cs = []
        for t in range(L):
            f = inputs[:, :, t][..., None]                    # (B, E, 1)
            c = c @ A.T + f * Bv[None, None, :]               # F.linear(c, A) + f @ B
            cs.append(c)
        x_in_c = np.stack(cs, axis=-1)                        # (B, E, NH, L)
        x_ft = np.fft.rfft(x_in_c, axis=-1)
        out_ft = np.zeros((B, E, NH, L // 2 + 1), dtype=np.complex128)
        out_ft[:, :, :, :K] = np.einsum('bjix,iox->bjox', x_ft[:, :, :, :K], W)
        out1 = np.fft.irfft(out_ft, n=L, axis=-1)             # (B, E, NH, L)
        x_dec_c = out1[:, :, :, L - 1]                        # (B, E, NH)
        x_decs.append(x_dec_c @ evm[-L:, :].T)                # (B, E, L)

    xs = np.stack(x_decs, axis=-1)                            # (B, E, L, NS)
    x_dec = xs @ mlp_w + mlp_b[0]                             # (B, E, L)
    x_dec = x_dec.transpose(0, 2, 1)                          # (B, L, E)
    x_dec = (x_dec - aff_b[None, None, :]) / (aff_w[None, None, :] + 1e-10)
    x_dec = x_dec * stdev + means
    feat = x_dec.transpose(0, 2, 1).mean(-1)                  # (B, E)   feat_select == 'mean'
    return feat @ fc_w.T + fc_b                               # (B, OUT)


# --------------------------------------- main ---------------------------------------
if __name__ == "__main__":
    key = jax.random.PRNGKey(0)
    k_x, k_wr, k_wi, k_mw, k_mb, k_fw, k_fb = jax.random.split(key, 7)

    # input, PyTorch convention (B, seq_len, enc_in)
    x_enc = jax.random.normal(k_x, (B, L, E), dtype=jnp.float32)

    # HiPPO-LegT buffers per scale (deterministic, as in module __init__), float64
    a_cont, b_cont = lmu_transition(NH)
    A_list, Bv_list, eval_list = [], [], []
    for ms in MULTISCALE:
        dt = 1.0 / L / ms
        ad, bd = bilinear_discretize(a_cont, b_cont, dt)
        vals = np.arange(0.0, 1.0, dt)
        A_list.append(ad)
        Bv_list.append(bd.squeeze(-1))
        eval_list.append(legendre_eval_matrix(NH, vals))

    # SpectralConv1d weights (cfloat rand scaled by 1/(in*out)), deterministic here
    scale_w = 1.0 / (NH * NH)
    w1r = scale_w * jax.random.uniform(k_wr, (NS, NH, NH, K), dtype=jnp.float32)
    w1i = scale_w * jax.random.uniform(k_wi, (NS, NH, NH, K), dtype=jnp.float32)
    W_list = [np.asarray(w1r[s], np.float64) + 1j * np.asarray(w1i[s], np.float64)
              for s in range(NS)]                                        # (NH_in, NH_out, K)

    # mlp: Linear(NS, 1); fc: Linear(d_model=E, OUT); affine params are ones/zeros
    bnd_mlp = 1.0 / math.sqrt(NS)
    mlp_w = jax.random.uniform(k_mw, (NS,), minval=-bnd_mlp, maxval=bnd_mlp, dtype=jnp.float32)
    mlp_b = jax.random.uniform(k_mb, (1,), minval=-bnd_mlp, maxval=bnd_mlp, dtype=jnp.float32)
    bnd_fc = 1.0 / math.sqrt(E)
    fc_w = jax.random.uniform(k_fw, (OUT, E), minval=-bnd_fc, maxval=bnd_fc, dtype=jnp.float32)
    fc_b = jax.random.uniform(k_fb, (OUT,), minval=-bnd_fc, maxval=bnd_fc, dtype=jnp.float32)
    aff_w = np.ones((E,), np.float64)
    aff_b = np.zeros((E,), np.float64)

    # ---- host-side fusion: all scales + multiscale mlp -> (L, L); then fold the
    #      temporal mean (feat_select='mean') -> single length-L transfer vector ----
    mlp_w_np = np.asarray(mlp_w, np.float64)
    T_total = np.zeros((L, L), np.float64)
    for s in range(NS):
        T_total += mlp_w_np[s] * build_scale_transfer(A_list[s], Bv_list[s],
                                                      eval_list[s], W_list[s])
    t_vec = T_total.mean(axis=1)                              # (L,)

    # ---- pack ALL small parameters into one (8, L) slab: a single extra DMA ----
    prm_np = np.zeros((8, L), np.float32)
    prm_np[_R_TVEC, :] = t_vec.astype(np.float32)
    prm_np[_R_AFF:_R_AFF + E, _C_AFFW] = aff_w.astype(np.float32)
    prm_np[_R_AFF:_R_AFF + E, _C_AFFB] = aff_b.astype(np.float32)
    prm_np[_R_AFF:_R_AFF + E, _C_FCW:_C_FCW + OUT] = np.asarray(fc_w, np.float32).T  # (E, OUT)
    prm_np[_R_FCB, _C_FCW:_C_FCW + OUT] = np.asarray(fc_b, np.float32)
    prm_np[_R_MLPB, 0] = float(np.asarray(mlp_b)[0])
    prm = jnp.asarray(prm_np)

    # (B, L, E) -> (B, E, L): the same transpose the module applies before its HiPPO stack.
    # TODO(synk): at production sizes fold this into the BlockSpec index_map instead of an
    # XLA transpose that round-trips HBM.
    x_bel = jnp.transpose(x_enc, (0, 2, 1))

    out_kernel = jax.block_until_ready(film_forward_pallas(x_bel, prm))

    # ---- reference check (float64 numpy mirror of the PyTorch forward) ----
    out_ref = film_forward_reference_np(
        x_enc, A_list, Bv_list, eval_list, W_list,
        aff_w, aff_b, mlp_w_np, np.asarray(mlp_b, np.float64),
        np.asarray(fc_w, np.float64), np.asarray(fc_b, np.float64))

    err = float(np.max(np.abs(np.asarray(out_kernel, np.float64) - out_ref)))
    if not np.allclose(np.asarray(out_kernel, np.float64), out_ref, rtol=5e-2, atol=5e-3):
        raise AssertionError(f"Pallas kernel mismatch vs reference, max abs err = {err}")

    print("KERNEL_OK")
</pallas_src>

<mosaic_0001>
module attributes {stable_mosaic.version = 11 : i64} {
  func.func @film_kernel(%arg0: memref<2x4x16xf32, #tpu.memory_space<vmem>>, %arg1: memref<8x16xf32, #tpu.memory_space<vmem>>, %arg2: memref<2x3xf32, #tpu.memory_space<vmem>>) attributes {dimension_semantics = [], scalar_prefetch = 0 : i64, scratch_operands = 0 : i64, tpu.core_type = #tpu.core_type<tc>} {
    %c0 = arith.constant 0 : index
    %c0_0 = arith.constant 0 : index
    %c0_1 = arith.constant 0 : index
    %0 = vector.load %arg0[%c0, %c0_0, %c0_1] : memref<2x4x16xf32, #tpu.memory_space<vmem>>, vector<2x4x16xf32>
    %cst = arith.constant dense<0.000000e+00> : vector<2x4xf32>
    %1 = vector.multi_reduction <add>, %0, %cst [2] : vector<2x4x16xf32> to vector<2x4xf32>
    %2 = vector.shape_cast %1 : vector<2x4xf32> to vector<2x4x1xf32>
    %cst_2 = arith.constant 1.600000e+01 : f32
    %3 = vector.broadcast %cst_2 : f32 to vector<2x4x1xf32>
    %4 = arith.divf %2, %3 : vector<2x4x1xf32>
    %5 = vector.broadcast %4 : vector<2x4x1xf32> to vector<2x4x16xf32>
    %6 = arith.subf %0, %5 : vector<2x4x16xf32>
    %7 = arith.mulf %6, %6 : vector<2x4x16xf32>
    %cst_3 = arith.constant dense<0.000000e+00> : vector<2x4xf32>
    %8 = vector.multi_reduction <add>, %7, %cst_3 [2] : vector<2x4x16xf32> to vector<2x4xf32>
    %9 = vector.shape_cast %8 : vector<2x4xf32> to vector<2x4x1xf32>
    %cst_4 = arith.constant 1.600000e+01 : f32
    %10 = vector.broadcast %cst_4 : f32 to vector<2x4x1xf32>
    %11 = arith.divf %9, %10 : vector<2x4x1xf32>
    %cst_5 = arith.constant 9.99999974E-6 : f32
    %12 = vector.broadcast %cst_5 : f32 to vector<2x4x1xf32>
    %13 = arith.addf %11, %12 : vector<2x4x1xf32>
    %14 = math.sqrt %13 : vector<2x4x1xf32>
    %c1 = arith.constant 1 : index
    %c0_6 = arith.constant 0 : index
    %15 = vector.load %arg1[%c1, %c0_6] : memref<8x16xf32, #tpu.memory_space<vmem>>, vector<4x1xf32>
    %c1_7 = arith.constant 1 : index
    %c1_8 = arith.constant 1 : index
    %16 = vector.load %arg1[%c1_7, %c1_8] : memref<8x16xf32, #tpu.memory_space<vmem>>, vector<4x1xf32>
    %17 = vector.broadcast %14 : vector<2x4x1xf32> to vector<2x4x16xf32>
    %18 = arith.divf %6, %17 : vector<2x4x16xf32>
    %19 = vector.shape_cast %15 : vector<4x1xf32> to vector<1x4x1xf32>
    %20 = vector.broadcast %19 : vector<1x4x1xf32> to vector<2x4x16xf32>
    %21 = arith.mulf %18, %20 : vector<2x4x16xf32>
    %22 = vector.shape_cast %16 : vector<4x1xf32> to vector<1x4x1xf32>
    %23 = vector.broadcast %22 : vector<1x4x1xf32> to vector<2x4x16xf32>
    %24 = arith.addf %21, %23 : vector<2x4x16xf32>
    %c0_9 = arith.constant 0 : index
    %c0_10 = arith.constant 0 : index
    %25 = vector.load %arg1[%c0_9, %c0_10] : memref<8x16xf32, #tpu.memory_space<vmem>>, vector<1x16xf32>
    %c6 = arith.constant 6 : index
    %c0_11 = arith.constant 0 : index
    %26 = vector.load %arg1[%c6, %c0_11] : memref<8x16xf32, #tpu.memory_space<vmem>>, vector<1x1xf32>
    %27 = vector.shape_cast %25 : vector<1x16xf32> to vector<1x1x16xf32>
    %28 = vector.broadcast %27 : vector<1x1x16xf32> to vector<2x4x16xf32>
    %29 = arith.mulf %24, %28 : vector<2x4x16xf32>
    %cst_12 = arith.constant dense<0.000000e+00> : vector<2x4xf32>
    %30 = vector.multi_reduction <add>, %29, %cst_12 [2] : vector<2x4x16xf32> to vector<2x4xf32>
    %31 = vector.shape_cast %30 : vector<2x4xf32> to vector<2x4x1xf32>
    %32 = vector.shape_cast %26 : vector<1x1xf32> to vector<1x1x1xf32>
    %33 = vector.broadcast %32 : vector<1x1x1xf32> to vector<2x4x1xf32>
    %34 = arith.addf %31, %33 : vector<2x4x1xf32>
    %35 = vector.shape_cast %16 : vector<4x1xf32> to vector<1x4x1xf32>
    %36 = vector.broadcast %35 : vector<1x4x1xf32> to vector<2x4x1xf32>
    %37 = arith.subf %34, %36 : vector<2x4x1xf32>
    %cst_13 = arith.constant 1.000000e-10 : f32
    %38 = vector.broadcast %cst_13 : f32 to vector<4x1xf32>
    %39 = arith.addf %15, %38 : vector<4x1xf32>
    %40 = vector.shape_cast %39 : vector<4x1xf32> to vector<1x4x1xf32>
    %41 = vector.broadcast %40 : vector<1x4x1xf32> to vector<2x4x1xf32>
    %42 = arith.divf %37, %41 : vector<2x4x1xf32>
    %43 = arith.mulf %42, %14 : vector<2x4x1xf32>
    %44 = arith.addf %43, %4 : vector<2x4x1xf32>
    %c5 = arith.constant 5 : index
    %c2 = arith.constant 2 : index
    %45 = vector.load %arg1[%c5, %c2] : memref<8x16xf32, #tpu.memory_space<vmem>>, vector<1x3xf32>
    %46 = vector.extract_strided_slice %44 {offsets = [0, 0, 0], sizes = [2, 1, 1], strides = [1, 1, 1]} : vector<2x4x1xf32> to vector<2x1x1xf32>
    %47 = vector.shape_cast %46 : vector<2x1x1xf32> to vector<2x1xf32>
    %c1_14 = arith.constant 1 : index
    %c2_15 = arith.constant 2 : index
    %48 = vector.load %arg1[%c1_14, %c2_15] : memref<8x16xf32, #tpu.memory_space<vmem>>, vector<1x3xf32>
    %49 = vector.broadcast %47 : vector<2x1xf32> to vector<2x3xf32>
    %50 = vector.broadcast %48 : vector<1x3xf32> to vector<2x3xf32>
    %51 = arith.mulf %49, %50 : vector<2x3xf32>
    %52 = vector.broadcast %45 : vector<1x3xf32> to vector<2x3xf32>
    %53 = arith.addf %52, %51 : vector<2x3xf32>
    %54 = vector.extract_strided_slice %44 {offsets = [0, 1, 0], sizes = [2, 1, 1], strides = [1, 1, 1]} : vector<2x4x1xf32> to vector<2x1x1xf32>
    %55 = vector.shape_cast %54 : vector<2x1x1xf32> to vector<2x1xf32>
    %c2_16 = arith.constant 2 : index
    %c2_17 = arith.constant 2 : index
    %56 = vector.load %arg1[%c2_16, %c2_17] : memref<8x16xf32, #tpu.memory_space<vmem>>, vector<1x3xf32>
    %57 = vector.broadcast %55 : vector<2x1xf32> to vector<2x3xf32>
    %58 = vector.broadcast %56 : vector<1x3xf32> to vector<2x3xf32>
    %59 = arith.mulf %57, %58 : vector<2x3xf32>
    %60 = arith.addf %53, %59 : vector<2x3xf32>
    %61 = vector.extract_strided_slice %44 {offsets = [0, 2, 0], sizes = [2, 1, 1], strides = [1, 1, 1]} : vector<2x4x1xf32> to vector<2x1x1xf32>
    %62 = vector.shape_cast %61 : vector<2x1x1xf32> to vector<2x1xf32>
    %c3 = arith.constant 3 : index
    %c2_18 = arith.constant 2 : index
    %63 = vector.load %arg1[%c3, %c2_18] : memref<8x16xf32, #tpu.memory_space<vmem>>, vector<1x3xf32>
    %64 = vector.broadcast %62 : vector<2x1xf32> to vector<2x3xf32>
    %65 = vector.broadcast %63 : vector<1x3xf32> to vector<2x3xf32>
    %66 = arith.mulf %64, %65 : vector<2x3xf32>
    %67 = arith.addf %60, %66 : vector<2x3xf32>
    %68 = vector.extract_strided_slice %44 {offsets = [0, 3, 0], sizes = [2, 1, 1], strides = [1, 1, 1]} : vector<2x4x1xf32> to vector<2x1x1xf32>
    %69 = vector.shape_cast %68 : vector<2x1x1xf32> to vector<2x1xf32>
    %c4 = arith.constant 4 : index
    %c2_19 = arith.constant 2 : index
    %70 = vector.load %arg1[%c4, %c2_19] : memref<8x16xf32, #tpu.memory_space<vmem>>, vector<1x3xf32>
    %71 = vector.broadcast %69 : vector<2x1xf32> to vector<2x3xf32>
    %72 = vector.broadcast %70 : vector<1x3xf32> to vector<2x3xf32>
    %73 = arith.mulf %71, %72 : vector<2x3xf32>
    %74 = arith.addf %67, %73 : vector<2x3xf32>
    %c0_20 = arith.constant 0 : index
    %c0_21 = arith.constant 0 : index
    %75 = vector.load %arg2[%c0_20, %c0_21] : memref<2x3xf32, #tpu.memory_space<vmem>>, vector<2x3xf32>
    tpu.vector_store %arg2[%c0_20, %c0_21], %74 {strides = array<i32>} : memref<2x3xf32, #tpu.memory_space<vmem>>, vector<2x3xf32>,
    return
  }
}

</mosaic_0001>

<bundles_post_ra>
// kernel: tpu_custom_call.1
= control target key start
LH: loop header
LB: loop body
LE: loop exit
PB: predicated region body
PF: predicated region fallthrough
CT: control target
= control target key end

     0   :  { %7 = vsyncpa [#allocation3], 0  ;;  %s437_s0 = inlined_call_operand.hbm [shape: f32[2,4,16], index: 0, kind: input, shape index: {}]   ;;  %s438_s1 = inlined_call_operand.hbm [shape: f32[8,16], index: 1, kind: input, shape index: {}]   ;;  %s439_s2 = inlined_call_operand.hbm [shape: f32[2,3], index: 2, kind: output, shape index: {}]  }
   0x1   :  { %8 = vsyncpa [#allocation6], 0 }
   0x2   :  { %9 = vsyncpa [#allocation4], 0  ;;  %s347_s9 = smov [#allocation2]   ;;  %s275_s13 = scalar_lea.hbm %s437_s0, 128 }
   0x3   :  { %s15_s10 = sshll.u32 %s347_s9, 4  ;;  %p276_p0 = scmp.ne.s32.totalorder %s437_s0, %s275_s13  ;;  %s16_s10 = int_to_ptr.vmem [resolvable:$true] %s15_s10 }
   0x4   :  { %p279_p1 = scmp.lt.u32.totalorder %s275_s13, %s437_s0 }
   0x6   :  { %p281_p2 = pnand %p279_p1, %p276_p0 }
   0x8   :  { %284 = shalt.err (!%p281_p2)
}
   0x9   :  { %s285_s18 = scalar_lea.vmem %s16_s10, 128  ;;  %p290_p4 = scmp.lt.s32.totalorder %s16_s10, %s16_s10 }
   0xa   :  { %p286_p3 = scmp.ne.s32.totalorder %s16_s10, %s285_s18  ;;  %p291_p5 = scmp.lt.s32.totalorder %s285_s18, %s285_s18 }
   0xc   :  { %p292_p6 = por %p291_p5, %p290_p4 }
   0xe   :  { %p293_p7 = pnand %p292_p6, %p286_p3 }
  0x10   :  { %296 = shalt.err (!%p293_p7)
}
  0x11   :  { %s348_s19 = smov 64   ;;  %s349_s20 = smov 4  }
  0x12   :  { %21 = dma.hbm_to_vmem [thread:$0]  %s437_s0, 128, %s16_s10, [#allocation3], %s348_s19, %s348_s19, %s349_s20  }
  0x13   :  { %s350_s23 = smov [#allocation5]   ;;  %s297_s27 = scalar_lea.hbm %s438_s1, 128 }
  0x14   :  { %s28_s24 = sshll.u32 %s350_s23, 4  ;;  %p298_p8 = scmp.ne.s32.totalorder %s438_s1, %s297_s27  ;;  %s29_s24 = int_to_ptr.vmem [resolvable:$true] %s28_s24 }
  0x15   :  { %p301_p9 = scmp.lt.u32.totalorder %s297_s27, %s438_s1 }
  0x17   :  { %p303_p10 = pnand %p301_p9, %p298_p8 }
  0x19   :  { %306 = shalt.err (!%p303_p10)
}
  0x1a   :  { %s307_s4 = scalar_lea.vmem %s29_s24, 128  ;;  %p312_p12 = scmp.lt.s32.totalorder %s29_s24, %s29_s24 }
  0x1b   :  { %p308_p11 = scmp.ne.s32.totalorder %s29_s24, %s307_s4  ;;  %p313_p13 = scmp.lt.s32.totalorder %s307_s4, %s307_s4 }
  0x1d   :  { %p314_p0 = por %p313_p13, %p312_p12 }
  0x1f   :  { %p315_p1 = pnand %p314_p0, %p308_p11 }
  0x21   :  { %318 = shalt.err (!%p315_p1)
}
  0x22   :  { %31 = dma.hbm_to_vmem [thread:$0]  %s438_s1, 128, %s29_s24, [#allocation6]  }
  0x23   :  { %341 = dma.done.wait [#allocation3], 128  }
  0x24   :  { %342 = vsyncadd [#allocation3], 4294967168 }
  0x25   :  { %343 = dma.done.wait [#allocation6], 128  }
  0x26   :  { %344 = vsyncadd [#allocation6], 4294967168  ;;  %vm40_vm0 = vcmask 125952   ;;  %v39_v0 = vld [vmem:[#allocation2 + $0x4] sm:$0xf]  ;;  %v351_v5 = vmov 0  }
  0x27   :  { %v38_v1 = vld [vmem:[#allocation2] sm:$0xf]  ;;  %v44_v2 = vsel %vm40_vm0, %v39_v0, 0.0  ;;  %v398_v4 = vld [vmem:[#allocation5 + $0x1] sm:$0xf]  ;;  %262 = vset.pattern.permute.xlu0 %v351_v5  ;;  %v352_v6 = vmov 1  }
  0x28   :  { %45 = vadd.xlane.f32.xlu0 %v44_v2  ;;  %v41_v3 = vsel %vm40_vm0, %v38_v1, 0.0  ;;  %263 = vset.pattern.permute.xlu1 %v352_v6  ;;  %v245_v39 = vld [vmem:[#allocation5] ss:$0 sm:$0xff]  ;;  %s353_s1 = smov 127   ;;  %v247_v48 = vld [vmem:[#allocation5 + $0x1] ss:$0 sm:$0xff] }
  0x29   :  { %s354_s6 = smov 126   ;;  %v121_v49 = vadd.f32 1e-10, %v398_v4  ;;  %v246_v50 = vld [vmem:[#allocation5 + $0x6] ss:$0 sm:$0xff]  ;;  %vm158_vm5 = vcmask 1041409  }
  0x2a   :  { %v250_v2 = vld [vmem:[#allocation5 + $0x3] ss:$0 sm:$0xff]  ;;  %s355_s7 = smov 2   ;;  %s356_s8 = smov [#allocation7]   ;;  %vm227_vm6 = vcmask 17408  }
  0x2b   :  { %s235_s9 = sshll.u32 %s356_s8, 4  ;;  %s236_s9 = int_to_ptr.vmem [resolvable:$true] %s235_s9 }
  0x2c   :  { %42 = vadd.xlane.f32.xlu0 %v41_v3  ;;  %v251_v3 = vld [vmem:[#allocation5 + $0x4] ss:$0 sm:$0xff]  ;;  %s319_s10 = scalar_lea.vmem %s236_s9, 32  ;;  %p324_p3 = scmp.lt.s32.totalorder %s236_s9, %s236_s9 }
  0x2d   :  { %p320_p2 = scmp.ne.s32.totalorder %s236_s9, %s319_s10  ;;  %p325_p4 = scmp.lt.s32.totalorder %s319_s10, %s319_s10 }
  0x2f   :  { %p326_p5 = por %p325_p4, %p324_p3 }
  0x31   :  { %p327_p6 = pnand %p326_p5, %p320_p2 }
  0x42   :  { %85 = vperm.xlu0 %262, %v398_v4  }
  0xb5   :  { %v46_v7 = vpop.xlane.xlu0 %45 }
  0xb6   :  { %v401_v8 = vmul.f32 0.0625, %v46_v7 }
  0xb8   :  { %v51_v9 = vsub.f32 %v39_v0, %v401_v8 }
  0xb9   :  { %v43_v10 = vpop.xlane.xlu0 %42 }
  0xba   :  { %v404_v11 = vmul.f32 0.0625, %v43_v10  ;;  %v53_v12 = vmul.f32 %v51_v9, %v51_v9 }
  0xbc   :  { %v50_v13 = vsub.f32 %v38_v1, %v404_v11  ;;  %v57_v14 = vsel %vm40_vm0, %v53_v12, 0.0  ;;  %v249_v1 = vld [vmem:[#allocation5 + $0x2] ss:$0 sm:$0xff] }
  0xbd   :  { %58 = vadd.xlane.f32.xlu1 %v57_v14 }
  0xbe   :  { %v52_v15 = vmul.f32 %v50_v13, %v50_v13 }
  0xc0   :  { %v54_v16 = vsel %vm40_vm0, %v52_v15, 0.0 }
  0xc1   :  { %55 = vadd.xlane.f32.xlu1 %v54_v16  ;;  %v86_v34 = vpop.permute.xlu0 %85 }
  0xd2   :  { %91 = vperm.xlu1 %263, %v398_v4  }
  0xd6   :  { %264 = vset.pattern.permute.xlu1 %v351_v5 }
 0x14a   :  { %v59_v17 = vpop.xlane.xlu1 %58 }
 0x14b   :  { %v61_v18 = vmul.f32 0.0625, %v59_v17 }
 0x14d   :  { %v63_v19 = vadd.f32 1e-05, %v61_v18 }
 0x14e   :  { %v56_v20 = vpop.xlane.xlu1 %55 }
 0x14f   :  { %265 = vrsqrt.f32 %v63_v19  ;;  %v60_v21 = vmul.f32 0.0625, %v56_v20  ;;  %vm73_vm1 = vcmp.eq.f32.partialorder %v63_v19, inf  ;;  %v76_v25 = vand.u32 2147483648, %v63_v19 }
 0x150   :  { %vm75_vm2 = vcmp.eq.f32.partialorder %v63_v19, 0.0 }
 0x151   :  { %v62_v22 = vadd.f32 1e-05, %v60_v21 }
 0x152   :  { %v92_v36 = vpop.permute.xlu1 %91 }
 0x153   :  { %267 = vrsqrt.f32 %v62_v22  ;;  %vm66_vm3 = vcmp.eq.f32.partialorder %v62_v22, inf  ;;  %v69_v30 = vand.u32 2147483648, %v62_v22  ;;  %vm68_vm4 = vcmp.eq.f32.partialorder %v62_v22, 0.0 }
 0x159   :  { %v266_v23 = vpop.eup %265 }
 0x15a   :  { %v72_v24 = vmul.f32 %v266_v23, %v63_v19 }
 0x15c   :  { %v74_v26 = vsel %vm73_vm1, %v63_v19, %v72_v24 }
 0x15d   :  { %v268_v27 = vpop.eup %267  ;;  %v77_v28 = vsel %vm75_vm2, %v76_v25, %v74_v26 }
 0x15e   :  { %v65_v29 = vmul.f32 %v268_v27, %v62_v22  ;;  %269 = vrcp.f32 %v77_v28 }
 0x160   :  { %v67_v31 = vsel %vm66_vm3, %v62_v22, %v65_v29  ;;  %v248_v29 = vld [vmem:[#allocation5 + $0x5] ss:$0 sm:$0xff] }
 0x161   :  { %v70_v32 = vsel %vm68_vm4, %v69_v30, %v67_v31 }
 0x162   :  { %271 = vrcp.f32 %v70_v32 }
 0x163   :  { %273 = vrcp.f32 %v121_v49 }
 0x168   :  { %v270_v33 = vpop.eup %269 }
 0x169   :  { %v82_v35 = vmul.f32 %v270_v33, %v51_v9 }
 0x16b   :  { %v89_v37 = vmul.f32 %v86_v34, %v82_v35 }
 0x16c   :  { %v272_v38 = vpop.eup %271 }
 0x16d   :  { %v80_v40 = vmul.f32 %v272_v38, %v50_v13  ;;  %v95_v41 = vadd.f32 %v92_v36, %v89_v37  ;;  %v274_v53 = vpop.eup %273 }
 0x16f   :  { %v88_v42 = vmul.f32 %v86_v34, %v80_v40  ;;  %v103_v43 = vmul.f32 %v245_v39, %v95_v41 }
 0x171   :  { %v94_v44 = vadd.f32 %v92_v36, %v88_v42  ;;  %v107_v45 = vsel %vm40_vm0, %v103_v43, 0.0 }
 0x172   :  { %108 = vadd.xlane.f32.xlu1 %v107_v45 }
 0x173   :  { %v102_v46 = vmul.f32 %v245_v39, %v94_v44 }
 0x175   :  { %v104_v47 = vsel %vm40_vm0, %v102_v46, 0.0 }
 0x176   :  { %105 = vadd.xlane.f32.xlu0 %v104_v47 }
 0x183   :  { %116 = vrot.lane.b32.xlu1 %v398_v4, %s353_s1 }
 0x18c   :  { %146 = vrot.lane.b32.xlu0 %v247_v48, %s354_s6 }
 0x1ff   :  { %v109_v51 = vpop.xlane.xlu1 %108 }
 0x200   :  { %v115_v52 = vadd.f32 %v246_v50, %v109_v51 }
 0x203   :  { %v117_v54 = vpop.permute.xlu1 %116  ;;  %v106_v55 = vpop.xlane.xlu0 %105 }
 0x204   :  { %v120_v56 = vsub.f32 %v115_v52, %v117_v54  ;;  %v114_v57 = vadd.f32 %v246_v50, %v106_v55 }
 0x206   :  { %v124_v58 = vmul.f32 %v274_v53, %v120_v56  ;;  %v119_v59 = vsub.f32 %v114_v57, %v117_v54 }
 0x207   :  { %v147_v4 = vpop.permute.xlu0 %146 }
 0x208   :  { %v126_v60 = vmul.f32 %v124_v58, %v77_v28  ;;  %v123_v61 = vmul.f32 %v274_v53, %v119_v59 }
 0x20a   :  { %v128_v62 = vadd.f32 %v126_v60, %v401_v8  ;;  %v125_v63 = vmul.f32 %v123_v61, %v70_v32 }
 0x20c   :  { %138 = vperm.xlu1 %264, %v128_v62   ;;  %v127_v0 = vadd.f32 %v125_v63, %v404_v11 }
 0x210   :  { %133 = vperm.xlu1 %264, %v127_v0  }
 0x214   :  { %170 = vrot.lane.b32.xlu1 %v249_v1, %s354_s6 }
 0x218   :  { %189 = vrot.lane.b32.xlu1 %v250_v2, %s354_s6 }
 0x21c   :  { %209 = vrot.lane.b32.xlu1 %v251_v3, %s354_s6 }
 0x28b   :  { %v139_v5 = vpop.permute.xlu1 %138 }
 0x28c   :  { %v150_v6 = vmul.f32 %v147_v4, %v139_v5 }
 0x28e   :  { %v157_v8 = vrot.slane %v150_v6, 7 }
 0x28f   :  { %v134_v7 = vpop.permute.xlu1 %133 }
 0x290   :  { %v149_v9 = vmul.f32 %v147_v4, %v134_v7 }
 0x292   :  { %v159_v10 = vsel %vm158_vm5, %v157_v8, %v149_v9 }
 0x293   :  { %v171_v11 = vpop.permute.xlu1 %170  ;;  %160 = vrot.lane.b32.xlu1 %v159_v10, %s355_s7 }
 0x294   :  { %v173_v12 = vmul.f32 %v171_v11, %v134_v7  ;;  %v174_v13 = vmul.f32 %v171_v11, %v139_v5 }
 0x296   :  { %v177_v14 = vrot.slane %v173_v12, 1 }
 0x297   :  { %v190_v15 = vpop.permute.xlu1 %189 }
 0x298   :  { %v192_v16 = vmul.f32 %v190_v15, %v134_v7  ;;  %v193_v17 = vmul.f32 %v190_v15, %v139_v5  ;;  %v178_v18 = vsel %vm158_vm5, %v174_v13, %v177_v14 }
 0x299   :  { %179 = vrot.lane.b32.xlu1 %v178_v18, %s355_s7 }
 0x29a   :  { %v196_v19 = vrot.slane %v192_v16, 2  ;;  %v197_v20 = vrot.slane %v193_v17, 1 }
 0x29b   :  { %v210_v21 = vpop.permute.xlu1 %209 }
 0x29c   :  { %v212_v22 = vmul.f32 %v210_v21, %v134_v7  ;;  %v213_v23 = vmul.f32 %v210_v21, %v139_v5  ;;  %v198_v24 = vsel %vm158_vm5, %v197_v20, %v196_v19 }
 0x29d   :  { %199 = vrot.lane.b32.xlu0 %v198_v24, %s355_s7 }
 0x29e   :  { %v216_v25 = vrot.slane %v212_v22, 3  ;;  %v217_v26 = vrot.slane %v213_v23, 2 }
 0x2a0   :  { %v218_v27 = vsel %vm158_vm5, %v217_v26, %v216_v25 }
 0x2a1   :  { %219 = vrot.lane.b32.xlu1 %v218_v27, %s355_s7 }
 0x305   :  { %v161_v28 = vpop.permute.xlu1 %160 }
 0x306   :  { %v163_v31 = vadd.f32 %v248_v29, %v161_v28 }
 0x30b   :  { %v180_v30 = vpop.permute.xlu1 %179 }
 0x30c   :  { %v182_v33 = vadd.f32 %v180_v30, %v163_v31 }
 0x30f   :  { %v200_v32 = vpop.permute.xlu0 %199 }
 0x310   :  { %v202_v34 = vadd.f32 %v200_v32, %v182_v33 }
 0x313   :  { %v220_v35 = vpop.permute.xlu1 %219 }
 0x314   :  { %v222_v36 = vadd.f32 %v220_v35, %v202_v34 }
 0x316   :  { %224 = vrot.lane.b32.xlu0 %v222_v36, %s354_s6 }
 0x388   :  { %v225_v37 = vpop.permute.xlu0 %224 }
 0x389   :  { %228 = vst.msk [vmem:[#allocation7] sm:$0x3] %vm227_vm6, %v225_v37 }
 0x38a   :  { %330 = shalt.err (!%p327_p6)
}
 0x38b   :  { %s331_s13 = scalar_lea.hbm %s439_s2, 32 }
 0x38c   :  { %p332_p7 = scmp.ne.s32.totalorder %s439_s2, %s331_s13  ;;  %p335_p8 = scmp.lt.u32.totalorder %s331_s13, %s439_s2 }
 0x38e   :  { %p337_p9 = pnand %p335_p8, %p332_p7 }
 0x390   :  { %340 = shalt.err (!%p337_p9)
}
 0x391   :  { %238 = dma.vmem_to_hbm [thread:$0]  %s236_s9, 32, %s439_s2, [#allocation4]  }
 0x392   :  { %345 = dma.done.wait [#allocation4], 32  }
 0x393   :  { %346 = vsyncadd [#allocation4], 4294967264 }
 0x394   :  { %242 = vsyncpa [#allocation3], 1 }
 0x395   :  { %243 = vsyncpa [#allocation6], 1 }
 0x396   :  { %244 = vsyncpa [#allocation4], 1 }

</bundles_post_ra>
